<compile_context>
chip_gen: v7x
topology: tpu7x:2x2x1
jax: 0.10.0
libtpu: 0.0.40
codegen_flags: <defaults>
</compile_context>

<pallas_src>
import functools

import jax
import jax.numpy as jnp
from jax.experimental import pallas as pl
from jax.experimental.pallas import tpu as pltpu


def _round_up(a, m):
    return ((a + m - 1) // m) * m


def graphnet_kernel(x_ref, w1_ref, b1_ref, w2_ref, b2_ref, w3_ref, b3_ref, o_ref):
    # x: (TB, IN) f32 -> cast to bf16 in-vreg (MXU inputs); accumulate / elementwise in f32.
    x = x_ref[...].astype(jnp.bfloat16)

    # fc1 + ReLU
    h1 = jnp.dot(x, w1_ref[...], preferred_element_type=jnp.float32) + b1_ref[...]
    h1 = jnp.maximum(h1, 0.0)

    # fc2 + ReLU
    h2 = jnp.dot(h1.astype(jnp.bfloat16), w2_ref[...],
                 preferred_element_type=jnp.float32) + b2_ref[...]
    h2 = jnp.maximum(h2, 0.0)

    # fc3 (narrow class dim — block dim equals full array dim, no padding / masking)
    logits = jnp.dot(h2.astype(jnp.bfloat16), w3_ref[...],
                     preferred_element_type=jnp.float32) + b3_ref[...]

    # softmax over dim=1 (class axis), f32; exact divide so rows sum to 1 within f32 eps.
    m = jnp.max(logits, axis=-1, keepdims=True)
    e = jnp.exp(logits - m)
    s = jnp.sum(e, axis=-1, keepdims=True)
    o_ref[...] = (e / s).astype(o_ref.dtype)


def graphnet_forward(x, params, *, batch_tile=4096):
    """x: (B, input_size) float32. params: (in, out) f32 weights, (1, out) f32 biases."""
    B, input_size = x.shape
    num_neurons = params["w1"].shape[1]
    n_classes = params["w3"].shape[1]

    # bf16 MXU weight operands (tiny, VMEM-resident); biases stay f32.
    w1 = params["w1"].astype(jnp.bfloat16)
    w2 = params["w2"].astype(jnp.bfloat16)
    w3 = params["w3"].astype(jnp.bfloat16)
    b1 = params["b1"].astype(jnp.float32)
    b2 = params["b2"].astype(jnp.float32)
    b3 = params["b3"].astype(jnp.float32)

    # --- batch tiling ---------------------------------------------------------
    # TB multiple of 8 sublanes (or the whole batch). For large batches that fit in a
    # single tile, split into >=2 grid steps so v7x's second TensorCore gets work
    # (the ~0.35 us/step overhead is noise at >=2048 rows/tile).
    tb_full = _round_up(B, 8)
    TB = min(batch_tile, tb_full)
    if TB == tb_full and tb_full >= 4096:
        TB = _round_up(pl.cdiv(tb_full, 2), 8)
    B_pad = _round_up(B, TB)

    x_f32 = x.astype(jnp.float32)
    if B_pad != B:
        x_f32 = jnp.pad(x_f32, ((0, B_pad - B), (0, 0)))

    grid = (B_pad // TB,)

    def resident(shape):  # weights/biases: same block every grid step -> stay in VMEM
        return pl.BlockSpec(shape, lambda i: (0, 0))

    flops = 2 * B_pad * (input_size * num_neurons
                         + num_neurons * num_neurons
                         + num_neurons * n_classes)
    transcendentals = B_pad * n_classes  # exp per logit
    bytes_accessed = (x_f32.size * 4 + B_pad * n_classes * 4
                      + (w1.size + w2.size + w3.size) * 2
                      + (b1.size + b2.size + b3.size) * 4)

    out_padded = pl.pallas_call(
        graphnet_kernel,
        out_shape=jax.ShapeDtypeStruct((B_pad, n_classes), jnp.float32),
        grid=grid,
        in_specs=[
            pl.BlockSpec((TB, input_size), lambda i: (i, 0)),   # x: pipelined over batch
            resident((input_size, num_neurons)),                # w1
            resident((1, num_neurons)),                         # b1
            resident((num_neurons, num_neurons)),               # w2
            resident((1, num_neurons)),                         # b2
            resident((num_neurons, n_classes)),                 # w3
            resident((1, n_classes)),                           # b3
        ],
        out_specs=pl.BlockSpec((TB, n_classes), lambda i: (i, 0)),  # narrow f32 output
        compiler_params=pltpu.CompilerParams(
            # "parallel" lets the batch axis shard across v7x's two TCs; if a trace shows
            # only one core busy, switch to pltpu.CORE_PARALLEL / explicit core_map.
            dimension_semantics=("parallel",),
            vmem_limit_bytes=48 * 1024 * 1024,  # headroom under v7x's 64 MiB/TC
        ),
        cost_estimate=pl.CostEstimate(
            flops=flops,
            transcendentals=transcendentals,
            bytes_accessed=bytes_accessed,
        ),
    )(x_f32, w1, b1, w2, b2, w3, b3)

    return out_padded[:B] if B_pad != B else out_padded


def init_params(key, input_size, n_classes, num_neurons=32):
    """Deterministic synthetic init (shapes match the PyTorch module's Linears)."""
    k1, k2, k3, k4, k5, k6 = jax.random.split(key, 6)
    # PyTorch stores (out, in); we keep the transposed (in, out) form for the kernel.
    w1 = jax.random.normal(k1, (input_size, num_neurons), jnp.float32) * (1.0 / jnp.sqrt(input_size))
    b1 = jax.random.normal(k2, (1, num_neurons), jnp.float32) * 0.01
    w2 = jax.random.normal(k3, (num_neurons, num_neurons), jnp.float32) * (1.0 / jnp.sqrt(num_neurons))
    b2 = jax.random.normal(k4, (1, num_neurons), jnp.float32) * 0.01
    w3 = jax.random.normal(k5, (num_neurons, n_classes), jnp.float32) * (1.0 / jnp.sqrt(num_neurons))
    b3 = jax.random.normal(k6, (1, n_classes), jnp.float32) * 0.01
    return {"w1": w1, "b1": b1, "w2": w2, "b2": b2, "w3": w3, "b3": b3}


def reference_forward_f32(x, p):
    h1 = jnp.maximum(x @ p["w1"] + p["b1"], 0.0)
    h2 = jnp.maximum(h1 @ p["w2"] + p["b2"], 0.0)
    logits = h2 @ p["w3"] + p["b3"]
    return jax.nn.softmax(logits, axis=1)


def reference_forward_bf16(x, p):
    bf = jnp.bfloat16
    h1 = jnp.maximum(jnp.dot(x.astype(bf), p["w1"].astype(bf),
                             preferred_element_type=jnp.float32) + p["b1"], 0.0)
    h2 = jnp.maximum(jnp.dot(h1.astype(bf), p["w2"].astype(bf),
                             preferred_element_type=jnp.float32) + p["b2"], 0.0)
    logits = jnp.dot(h2.astype(bf), p["w3"].astype(bf),
                     preferred_element_type=jnp.float32) + p["b3"]
    return jax.nn.softmax(logits, axis=1)


def _check(out, x, params, n_classes):
    ref_matched = reference_forward_bf16(x, params)   # same bf16-matmul / f32-accumulate recipe
    ref_f32 = reference_forward_f32(x, params)        # full-precision module semantics
    assert out.shape == (x.shape[0], n_classes)
    assert jnp.allclose(out, ref_matched, atol=5e-3, rtol=5e-3), "mismatch vs bf16-matched reference"
    assert jnp.allclose(out, ref_f32, atol=5e-2, rtol=5e-2), "mismatch vs f32 reference"
    assert jnp.allclose(jnp.sum(out, axis=1), 1.0, atol=1e-4), "softmax rows must sum to 1"


if __name__ == "__main__":
    key = jax.random.PRNGKey(0)
    kx, kx2, kp = jax.random.split(key, 3)

    input_size = 16
    n_classes = 4
    num_neurons = 32
    params = init_params(kp, input_size, n_classes, num_neurons)

    # Aligned small batch.
    x = jax.random.normal(kx, (8, input_size), jnp.float32)
    out = jax.block_until_ready(graphnet_forward(x, params))
    _check(out, x, params, n_classes)

    # Unaligned batch (exercises the batch-padding path).
    x2 = jax.random.normal(kx2, (13, input_size), jnp.float32)
    out2 = jax.block_until_ready(graphnet_forward(x2, params))
    _check(out2, x2, params, n_classes)

    print("KERNEL_OK")
</pallas_src>

<mosaic_0001>
module attributes {stable_mosaic.version = 11 : i64} {
  func.func @graphnet_kernel(%arg0: i32, %arg1: memref<8x16xf32, #tpu.memory_space<vmem>>, %arg2: memref<16x32xbf16, #tpu.memory_space<vmem>>, %arg3: memref<1x32xf32, #tpu.memory_space<vmem>>, %arg4: memref<32x32xbf16, #tpu.memory_space<vmem>>, %arg5: memref<1x32xf32, #tpu.memory_space<vmem>>, %arg6: memref<32x4xbf16, #tpu.memory_space<vmem>>, %arg7: memref<1x4xf32, #tpu.memory_space<vmem>>, %arg8: memref<8x4xf32, #tpu.memory_space<vmem>>) attributes {dimension_semantics = [#tpu.dimension_semantics<parallel>], iteration_bounds = array<i64: 1>, scalar_prefetch = 0 : i64, scratch_operands = 0 : i64, tpu.core_type = #tpu.core_type<tc>, window_params = [{transform_indices = @transform_0, window_bounds = array<i64: 8, 16>}, {pipeline_mode = #tpu.pipeline_mode<synchronous>, transform_indices = @transform_1, window_bounds = array<i64: 16, 32>}, {pipeline_mode = #tpu.pipeline_mode<synchronous>, transform_indices = @transform_2, window_bounds = array<i64: 1, 32>}, {pipeline_mode = #tpu.pipeline_mode<synchronous>, transform_indices = @transform_3, window_bounds = array<i64: 32, 32>}, {pipeline_mode = #tpu.pipeline_mode<synchronous>, transform_indices = @transform_4, window_bounds = array<i64: 1, 32>}, {pipeline_mode = #tpu.pipeline_mode<synchronous>, transform_indices = @transform_5, window_bounds = array<i64: 32, 4>}, {pipeline_mode = #tpu.pipeline_mode<synchronous>, transform_indices = @transform_6, window_bounds = array<i64: 1, 4>}, {transform_indices = @transform_7, window_bounds = array<i64: 8, 4>}]} {
    %c0 = arith.constant 0 : index
    %c0_0 = arith.constant 0 : index
    %0 = vector.load %arg1[%c0, %c0_0] : memref<8x16xf32, #tpu.memory_space<vmem>>, vector<8x16xf32>
    %1 = arith.truncf %0 : vector<8x16xf32> to vector<8x16xbf16>
    %c0_1 = arith.constant 0 : index
    %c0_2 = arith.constant 0 : index
    %2 = vector.load %arg2[%c0_1, %c0_2] : memref<16x32xbf16, #tpu.memory_space<vmem>>, vector<16x32xbf16>
    %cst = arith.constant dense<0.000000e+00> : vector<8x32xf32>
    %3 = tpu.matmul %1, %2, %cst {dimension_numbers = #tpu.dot_dimension_numbers<[1], [0], [0], [1], [0, 0, 1, 1], [], []>} : vector<8x16xbf16>, vector<16x32xbf16>, vector<8x32xf32> -> vector<8x32xf32>
    %c0_3 = arith.constant 0 : index
    %c0_4 = arith.constant 0 : index
    %4 = vector.load %arg3[%c0_3, %c0_4] : memref<1x32xf32, #tpu.memory_space<vmem>>, vector<1x32xf32>
    %5 = vector.broadcast %4 : vector<1x32xf32> to vector<8x32xf32>
    %6 = arith.addf %3, %5 : vector<8x32xf32>
    %cst_5 = arith.constant 0.000000e+00 : f32
    %7 = vector.broadcast %cst_5 : f32 to vector<8x32xf32>
    %8 = arith.maximumf %6, %7 : vector<8x32xf32>
    %9 = arith.truncf %8 : vector<8x32xf32> to vector<8x32xbf16>
    %c0_6 = arith.constant 0 : index
    %c0_7 = arith.constant 0 : index
    %10 = vector.load %arg4[%c0_6, %c0_7] : memref<32x32xbf16, #tpu.memory_space<vmem>>, vector<32x32xbf16>
    %cst_8 = arith.constant dense<0.000000e+00> : vector<8x32xf32>
    %11 = tpu.matmul %9, %10, %cst_8 {dimension_numbers = #tpu.dot_dimension_numbers<[1], [0], [0], [1], [0, 0, 1, 1], [], []>} : vector<8x32xbf16>, vector<32x32xbf16>, vector<8x32xf32> -> vector<8x32xf32>
    %c0_9 = arith.constant 0 : index
    %c0_10 = arith.constant 0 : index
    %12 = vector.load %arg5[%c0_9, %c0_10] : memref<1x32xf32, #tpu.memory_space<vmem>>, vector<1x32xf32>
    %13 = vector.broadcast %12 : vector<1x32xf32> to vector<8x32xf32>
    %14 = arith.addf %11, %13 : vector<8x32xf32>
    %cst_11 = arith.constant 0.000000e+00 : f32
    %15 = vector.broadcast %cst_11 : f32 to vector<8x32xf32>
    %16 = arith.maximumf %14, %15 : vector<8x32xf32>
    %17 = arith.truncf %16 : vector<8x32xf32> to vector<8x32xbf16>
    %c0_12 = arith.constant 0 : index
    %c0_13 = arith.constant 0 : index
    %18 = vector.load %arg6[%c0_12, %c0_13] : memref<32x4xbf16, #tpu.memory_space<vmem>>, vector<32x4xbf16>
    %cst_14 = arith.constant dense<0.000000e+00> : vector<8x4xf32>
    %19 = tpu.matmul %17, %18, %cst_14 {dimension_numbers = #tpu.dot_dimension_numbers<[1], [0], [0], [1], [0, 0, 1, 1], [], []>} : vector<8x32xbf16>, vector<32x4xbf16>, vector<8x4xf32> -> vector<8x4xf32>
    %c0_15 = arith.constant 0 : index
    %c0_16 = arith.constant 0 : index
    %20 = vector.load %arg7[%c0_15, %c0_16] : memref<1x4xf32, #tpu.memory_space<vmem>>, vector<1x4xf32>
    %21 = vector.broadcast %20 : vector<1x4xf32> to vector<8x4xf32>
    %22 = arith.addf %19, %21 : vector<8x4xf32>
    %cst_17 = arith.constant dense<0xFF800000> : vector<8xf32>
    %23 = vector.multi_reduction <maximumf>, %22, %cst_17 [1] : vector<8x4xf32> to vector<8xf32>
    %24 = vector.shape_cast %23 : vector<8xf32> to vector<8x1xf32>
    %25 = vector.broadcast %24 : vector<8x1xf32> to vector<8x4xf32>
    %26 = arith.subf %22, %25 : vector<8x4xf32>
    %27 = math.exp %26 : vector<8x4xf32>
    %cst_18 = arith.constant dense<0.000000e+00> : vector<8xf32>
    %28 = vector.multi_reduction <add>, %27, %cst_18 [1] : vector<8x4xf32> to vector<8xf32>
    %29 = vector.shape_cast %28 : vector<8xf32> to vector<8x1xf32>
    %30 = vector.broadcast %29 : vector<8x1xf32> to vector<8x4xf32>
    %31 = arith.divf %27, %30 : vector<8x4xf32>
    %c0_19 = arith.constant 0 : index
    %c0_20 = arith.constant 0 : index
    %32 = vector.load %arg8[%c0_19, %c0_20] : memref<8x4xf32, #tpu.memory_space<vmem>>, vector<8x4xf32>
    tpu.vector_store %arg8[%c0_19, %c0_20], %31 {strides = array<i32>} : memref<8x4xf32, #tpu.memory_space<vmem>>, vector<8x4xf32>,
    return
  }
  func.func @transform_0(%arg0: i32) -> (i32, i32) {
    %c0_i32 = arith.constant 0 : i32
    %c0_i32_0 = arith.constant 0 : i32
    return %arg0, %c0_i32 : i32, i32
  }
  func.func @transform_1(%arg0: i32) -> (i32, i32) {
    %c0_i32 = arith.constant 0 : i32
    %c0_i32_0 = arith.constant 0 : i32
    %c0_i32_1 = arith.constant 0 : i32
    return %c0_i32, %c0_i32_0 : i32, i32
  }
  func.func @transform_2(%arg0: i32) -> (i32, i32) {
    %c0_i32 = arith.constant 0 : i32
    %c0_i32_0 = arith.constant 0 : i32
    %c0_i32_1 = arith.constant 0 : i32
    return %c0_i32, %c0_i32_0 : i32, i32
  }
  func.func @transform_3(%arg0: i32) -> (i32, i32) {
    %c0_i32 = arith.constant 0 : i32
    %c0_i32_0 = arith.constant 0 : i32
    %c0_i32_1 = arith.constant 0 : i32
    return %c0_i32, %c0_i32_0 : i32, i32
  }
  func.func @transform_4(%arg0: i32) -> (i32, i32) {
    %c0_i32 = arith.constant 0 : i32
    %c0_i32_0 = arith.constant 0 : i32
    %c0_i32_1 = arith.constant 0 : i32
    return %c0_i32, %c0_i32_0 : i32, i32
  }
  func.func @transform_5(%arg0: i32) -> (i32, i32) {
    %c0_i32 = arith.constant 0 : i32
    %c0_i32_0 = arith.constant 0 : i32
    %c0_i32_1 = arith.constant 0 : i32
    return %c0_i32, %c0_i32_0 : i32, i32
  }
  func.func @transform_6(%arg0: i32) -> (i32, i32) {
    %c0_i32 = arith.constant 0 : i32
    %c0_i32_0 = arith.constant 0 : i32
    %c0_i32_1 = arith.constant 0 : i32
    return %c0_i32, %c0_i32_0 : i32, i32
  }
  func.func @transform_7(%arg0: i32) -> (i32, i32) {
    %c0_i32 = arith.constant 0 : i32
    %c0_i32_0 = arith.constant 0 : i32
    return %arg0, %c0_i32 : i32, i32
  }
}

</mosaic_0001>

<bundles_post_ra>
// kernel: tpu_custom_call.1
= control target key start
LH: loop header
LB: loop body
LE: loop exit
PB: predicated region body
PF: predicated region fallthrough
CT: control target
= control target key end

     0   :  { %12 = vsyncpa [#allocation3], 0  ;;  %s336_s24 = smov [#allocation2]   ;;  %s423_s0 = inlined_call_operand.vmem [shape: f32[8,16], index: 0, kind: input, shape index: {}]   ;;  %s424_s1 = inlined_call_operand.hbm [shape: bf16[16,32], index: 1, kind: input, shape index: {}]   ;;  %s425_s2 = inlined_call_operand.vmem [shape: f32[1,32], index: 2, kind: input, shape index: {}]   ;;  %s426_s3 = inlined_call_operand.vmem [shape: bf16[32,32], index: 3, kind: input, shape index: {}]   ;;  %s427_s4 = inlined_call_operand.vmem [shape: f32[1,32], index: 4, kind: input, shape index: {}]   ;;  %s428_s5 = inlined_call_operand.vmem [shape: bf16[32,4], index: 5, kind: input, shape index: {}]   ;;  %s429_s6 = inlined_call_operand.vmem [shape: f32[1,4], index: 6, kind: input, shape index: {}]   ;;  %s430_s7 = inlined_call_operand.vmem [shape: f32[8,4], index: 7, kind: output, shape index: {}]  }
   0x1   :  { %s20_s25 = sshll.u32 %s336_s24, 4  ;;  %s312_s28 = scalar_lea.hbm %s424_s1, 128  ;;  %s21_s25 = int_to_ptr.vmem [resolvable:$true] %s20_s25 }
   0x2   :  { %p313_p0 = scmp.ne.s32.totalorder %s424_s1, %s312_s28  ;;  %p316_p1 = scmp.lt.u32.totalorder %s312_s28, %s424_s1 }
   0x4   :  { %p318_p2 = pnand %p316_p1, %p313_p0 }
   0x6   :  { %321 = shalt.err (!%p318_p2)
}
   0x7   :  { %s322_s10 = scalar_lea.vmem %s21_s25, 128  ;;  %p327_p4 = scmp.lt.s32.totalorder %s21_s25, %s21_s25 }
   0x8   :  { %p323_p3 = scmp.ne.s32.totalorder %s21_s25, %s322_s10  ;;  %p328_p5 = scmp.lt.s32.totalorder %s322_s10, %s322_s10 }
   0xa   :  { %p329_p6 = por %p328_p5, %p327_p4 }
   0xc   :  { %p330_p7 = pnand %p329_p6, %p323_p3 }
   0xe   :  { %333 = shalt.err (!%p330_p7)
}
   0xf   :  { %s337_s11 = smov 64   ;;  %s338_s12 = smov 4  }
  0x10   :  { %26 = dma.hbm_to_vmem [thread:$0]  %s424_s1, 128, %s21_s25, [#allocation3], %s337_s11, %s337_s11, %s338_s12  }
  0x11   :  { %334 = dma.done.wait [#allocation3], 128  }
  0x12   :  { %335 = vsyncadd [#allocation3], 4294967168  ;;  %v339_v0 = vmov 0.0   ;;  %vm340_vm0 = vmmov 0   ;;  %v303_v1 = vld [vmem:[#allocation2] sm:$0xff]   ;;  %vm58_vm1 = vcmask 130048  }
  0x13   :  { %276 = vmatprep.subr.bf16.mxu0 %v339_v0  ;;  %278 = vmatprep.mubr.msk.bf16.mxu0 %vm340_vm0, %v339_v0  ;;  %v41_v2 = vld [vmem:[%s423_s0] sm:$0xff]  ;;  %v305_v5 = vld [vmem:[%s426_s3 + $0x8] sm:$0xff]   ;;  %vm127_vm2 = vcmask 261120   ;;  %vm239_vm3 = vcmask 31744  }
  0x14   :  { %282 = vmatprep.subr.bf16.mxu1 %v339_v0  ;;  %286 = vmatprep.mubr.msk.bf16.mxu1 %vm340_vm0, %v339_v0  ;;  %v42_v3 = vpack.c.bf16 %v41_v2, %v41_v2  ;;  %v304_v4 = vld [vmem:[%s426_s3] sm:$0xff]   ;;  %v307_v15 = vld [vmem:[%s428_s5 + $0x8] sm:$0xff]  }
  0x15   :  { %277 = vmatpush3.bf16.msra.mxu0 %v303_v1  ;;  %283 = vmatpush3.bf16.msra.mxu1 %v304_v4  ;;  %v306_v6 = vld [vmem:[%s428_s5] sm:$0xff]  }
  0x16   :  { %290 = vmatprep.subr.bf16.mxu0 %v339_v0  ;;  %284 = vmatprep.subr.bf16.mxu1 %v339_v0  ;;  %v257_v7 = vld [vmem:[%s425_s2] ss:$0 sm:$0xff] }
  0x17   :  { %v260_v16 = vld [vmem:[%s427_s4] ss:$0 sm:$0xff] }
  0x18   :  { %279 = vmatmul.mubr.msk.bf16.vlgmr.msra.gmra.mrb[0].mxu0 %vm58_vm1, %v42_v3  ;;  %v264_v24 = vld [vmem:[%s429_s6] ss:$0 sm:$0xff] }
  0x19   :  { %294 = vmatprep.mubr.msk.bf16.mxu0 %vm340_vm0, %v339_v0  ;;  %285 = vmatpush3.bf16.msra.mxu1 %v305_v5 }
  0x1a   :  { %291 = vmatpush3.bf16.msra.mxu0 %v306_v6 }
  0x1b   :  { %292 = vmatprep.subr.bf16.mxu0 %v339_v0 }
  0x1e   :  { %293 = vmatpush3.bf16.msra.mxu0 %v307_v15 }
  0xeb   :  { %v96_v8 = vpop.f32.mrb[0].mxu0 }
  0xec   :  { %v97_v9 = vadd.f32 %v257_v7, %v96_v8  ;;  %v280_v10 = vpop.f32.mrb[1].mxu0 }
  0xed   :  { %v99_v11 = vpop.f32.mrb[2].mxu0 }
  0xee   :  { %v102_v12 = vmax.f32 %v97_v9, 0.0  ;;  %v281_v13 = vpop.f32.mrb[3].mxu0 }
  0xf0   :  { %v103_v14 = vpack.c.bf16 %v102_v12, %v102_v12 }
  0xf2   :  { %287 = vmatmul.mubr.msk.bf16.vlgmr.msra.gmra.mrb[0].mxu1 %vm127_vm2, %v103_v14 }
 0x1c5   :  { %v165_v17 = vpop.f32.mrb[0].mxu1 }
 0x1c6   :  { %v166_v18 = vadd.f32 %v260_v16, %v165_v17  ;;  %v288_v19 = vpop.f32.mrb[1].mxu1 }
 0x1c7   :  { %v168_v20 = vpop.f32.mrb[2].mxu1 }
 0x1c8   :  { %v171_v21 = vmax.f32 %v166_v18, 0.0  ;;  %v289_v22 = vpop.f32.mrb[3].mxu1 }
 0x1ca   :  { %v172_v23 = vpack.c.bf16 %v171_v21, %v171_v21 }
 0x1cc   :  { %295 = vmatmul.mubr.msk.bf16.vlgmr.msra.gmra.mrb[4].mxu0 %vm127_vm2, %v172_v23 }
 0x29f   :  { %v233_v25 = vpop.f32.mrb[4].mxu0 }
 0x2a0   :  { %v234_v26 = vadd.f32 %v264_v24, %v233_v25  ;;  %v296_v27 = vpop.f32.mrb[5].mxu0 }
 0x2a1   :  { %v236_v28 = vpop.f32.mrb[6].mxu0 }
 0x2a2   :  { %v297_v29 = vpop.f32.mrb[7].mxu0  ;;  %v240_v30 = vsel %vm239_vm3, %v234_v26, -inf }
 0x2a3   :  { %241 = vmax.xlane.f32.xlu0 %v240_v30 }
 0x330   :  { %v242_v31 = vpop.xlane.xlu0 %241 }
 0x331   :  { %v243_v32 = vsub.f32 %v234_v26, %v242_v31 }
 0x333   :  { %v244_v33 = vmul.f32 1.442695, %v243_v32 }
 0x335   :  { %308 = vpow2.f32 %v244_v33 }
 0x33f   :  { %v309_v34 = vpop.eup %308 }
 0x340   :  { %v246_v35 = vsel %vm239_vm3, %v309_v34, 0.0 }
 0x341   :  { %247 = vadd.xlane.f32.xlu0 %v246_v35 }
 0x3ce   :  { %v248_v36 = vpop.xlane.xlu0 %247 }
 0x3cf   :  { %310 = vrcp.f32 %v248_v36 }
 0x3d9   :  { %v311_v37 = vpop.eup %310 }
 0x3da   :  { %v250_v38 = vmul.f32 %v311_v37, %v309_v34 }
 0x3dc   :  { %251 = vst.msk [vmem:[%s430_s7] sm:$0xff] %vm239_vm3, %v250_v38 }
 0x3dd   :  { %256 = vsyncpa [#allocation3], 1 }

</bundles_post_ra>
